<compile_context>
chip_gen: v6e
topology: v6e:2x2x1
jax: 0.10.0
libtpu: 0.0.40
codegen_flags: <defaults>
</compile_context>

<pallas_src>
import math

import jax
import jax.numpy as jnp
import numpy as np
from jax.experimental import pallas as pl
from jax.experimental.pallas import tpu as pltpu

EPS = 1e-5


# ---------------------------------------------------------------------------
# Fused kernel (single grid step at the tested size):
#   1) segmap MLP (shared trunk + merged gamma/beta heads), batched over N,
#      final layer already contains the W-expansion and the "+1",
#   2) expand per-batch (1+gamma, beta) to per-(n,c) rows via a tiny matmul,
#   3) per-row InstanceNorm stats (two-pass) + single FMA: out = x*a + b.
# ---------------------------------------------------------------------------
def ran_kernel(seg_ref, rsel_ref, x_ref,
               w0_ref, b0_ref, wt_ref, bt_ref,
               wh0_ref, bh0_ref, wh_ref, bh_ref, wl_ref, bl_ref,
               o_ref):
    # ---- segmap MLP (all matmuls on the MXU, M = N) -------------------------
    h = jnp.dot(seg_ref[...], w0_ref[...],
                preferred_element_type=jnp.float32) + b0_ref[...]       # (N, H)
    h = jnp.maximum(h, 0.0)
    for i in range(3):                                                  # trunk
        h = jnp.dot(h, wt_ref[i], preferred_element_type=jnp.float32) + bt_ref[i]
        h = jnp.maximum(h, 0.0)

    u = jnp.dot(h, wh0_ref[...],
                preferred_element_type=jnp.float32) + bh0_ref[...]      # (N, 2H)
    u = jnp.maximum(u, 0.0)
    for i in range(2):                                     # merged head layers
        u = jnp.dot(u, wh_ref[i], preferred_element_type=jnp.float32) + bh_ref[i]
        u = jnp.maximum(u, 0.0)

    # final merged layer: weights already expanded along W, "+1" folded in
    sb = jnp.dot(u, wl_ref[...],
                 preferred_element_type=jnp.float32) + bl_ref[...]      # (N, 2HW)

    # per-batch -> per-(n,c)-row expansion via a tiny selection matmul
    ss = jnp.dot(rsel_ref[...], sb,
                 preferred_element_type=jnp.float32)                    # (R, 2HW)
    HW = o_ref.shape[-1]
    scale = ss[:, :HW]            # == 1 + gamma, already broadcast over W
    shift = ss[:, HW:]            # == beta

    # ---- InstanceNorm2d (two-pass stats, one instance per row) + FMA --------
    x = x_ref[...]                                                      # (R, HW)
    inv_n = 1.0 / HW
    mean = jnp.sum(x, axis=1, keepdims=True) * inv_n                    # (R, 1)
    diff = x - mean
    var = jnp.sum(diff * diff, axis=1, keepdims=True) * inv_n           # (R, 1)
    a = jax.lax.rsqrt(var + EPS) * scale                                # (R, HW)
    o_ref[...] = x * a + (shift - mean * a)


# ---------------------------------------------------------------------------
# One-time weight packing (call at init / cache it, NOT per forward call).
# ---------------------------------------------------------------------------
def pack_params(params, H, W):
    (w0, b0, wt, bt, wg, bg, wb, bb) = params
    assert wg.shape[1:] == (H, H) and wb.shape[1:] == (H, H), (
        "MLP hidden dim must equal spatial height H")
    assert w0.shape[0] == 11
    HW = H * W

    # Merge gamma/beta heads into one block-diagonal matmul chain.
    zhh = jnp.zeros((H, H), jnp.float32)
    wh0 = jnp.concatenate([wg[0], wb[0]], axis=1)                        # (H, 2H)
    bh0 = jnp.concatenate([bg[0], bb[0]], axis=1)                        # (1, 2H)
    wh = jnp.stack([jnp.block([[wg[i], zhh], [zhh, wb[i]]])
                    for i in (1, 2)])                                    # (2,2H,2H)
    bh = jnp.stack([jnp.concatenate([bg[i], bb[i]], axis=1)
                    for i in (1, 2)])                                    # (2,1,2H)

    # Fold the W-expansion (gamma[h] replicated across the W lanes of row h)
    # and the "+1" into the final merged layer.
    # TODO(synk): for large H*W skip this fold (wlast scales with HW) and do
    # the W-broadcast in the wrapper instead.
    E = (jnp.arange(HW)[None, :] // W ==
         jnp.arange(H)[:, None]).astype(jnp.float32)                    # (H, HW)
    wge, wbe = wg[3] @ E, wb[3] @ E                                      # (H, HW)
    zhw = jnp.zeros((H, HW), jnp.float32)
    wlast = jnp.block([[wge, zhw], [zhw, wbe]])                          # (2H,2HW)
    blast = jnp.concatenate([bg[3] @ E + 1.0, bb[3] @ E], axis=1)        # (1, 2HW)

    return (w0, b0, wt, bt, wh0, bh0, wh, bh, wlast, blast)


# ---------------------------------------------------------------------------
# Per-call wrapper: only layout plumbing + one pallas_call.
# ---------------------------------------------------------------------------
@jax.jit
def ran_forward(x, segmap, packed):
    N, C, H, W = x.shape
    HW = H * W
    (w0, b0, wt, bt, wh0, bh0, wh, bh, wlast, blast) = packed
    assert w0.shape == (11, H), "packed params do not match spatial height H"
    # HW = 256 here -> lane-dense (multiple of 128); smaller spatial sizes
    # still work but with lane-masked stores.

    rows = N * C                              # one InstanceNorm instance per row
    x_flat = x.reshape(rows, HW)              # (8, 256): full sublane/lane fill
    seg2 = segmap.reshape(N, 11)              # segmap.view(-1, 11)
    # row -> batch one-hot selector (constant-folded by XLA at compile time)
    rsel = (jnp.arange(rows)[:, None] // C ==
            jnp.arange(N)[None, :]).astype(jnp.float32)                 # (rows, N)

    # Single coarse grid step at these sizes: the MLP runs once with M = N and
    # the per-step pipeline overhead is paid once.
    # TODO(synk): for production sizes tile rows (multiples of 8) over the grid
    # with dimension_semantics=("parallel",) so both v7x TensorCores get work.
    rows_per_block = rows
    grid = (rows // rows_per_block,)

    def const(a):
        return pl.BlockSpec(a.shape, lambda i, _nd=a.ndim: (0,) * _nd)

    out = pl.pallas_call(
        ran_kernel,
        out_shape=jax.ShapeDtypeStruct((rows, HW), jnp.float32),
        grid=grid,
        in_specs=[
            const(seg2),                                          # full segmap
            pl.BlockSpec((rows_per_block, N), lambda i: (i, 0)),  # row selector
            pl.BlockSpec((rows_per_block, HW), lambda i: (i, 0)), # x rows
            const(w0), const(b0), const(wt), const(bt),
            const(wh0), const(bh0), const(wh), const(bh),
            const(wlast), const(blast),
        ],
        out_specs=pl.BlockSpec((rows_per_block, HW), lambda i: (i, 0)),
        compiler_params=pltpu.CompilerParams(
            dimension_semantics=("arbitrary",),
            vmem_limit_bytes=32 * 1024 * 1024),
    )(seg2, rsel, x_flat, w0, b0, wt, bt, wh0, bh0, wh, bh, wlast, blast)

    return out.reshape(N, C, H, W)


# ---------------------------------------------------------------------------
# Deterministic parameter init (PyTorch-Linear-style uniform bounds),
# weights stored in (in, out) math layout.
# ---------------------------------------------------------------------------
def init_params(key, hidden):
    def linear(key, fan_in, fan_out):
        k1, k2 = jax.random.split(key)
        bound = 1.0 / math.sqrt(fan_in)
        w = jax.random.uniform(k1, (fan_in, fan_out), jnp.float32, -bound, bound)
        b = jax.random.uniform(k2, (1, fan_out), jnp.float32, -bound, bound)
        return w, b

    keys = jax.random.split(key, 12)
    w0, b0 = linear(keys[0], 11, hidden)
    wt_list, bt_list = zip(*[linear(keys[1 + i], hidden, hidden) for i in range(3)])
    wg_list, bg_list = zip(*[linear(keys[4 + i], hidden, hidden) for i in range(4)])
    wb_list, bb_list = zip(*[linear(keys[8 + i], hidden, hidden) for i in range(4)])
    return (w0, b0,
            jnp.stack(wt_list), jnp.stack(bt_list),
            jnp.stack(wg_list), jnp.stack(bg_list),
            jnp.stack(wb_list), jnp.stack(bb_list))


# ---------------------------------------------------------------------------
# Pure-JAX reference (mirrors the PyTorch module) for validation
# ---------------------------------------------------------------------------
def ran_reference(x, segmap, params):
    (w0, b0, wt, bt, wg, bg, wb, bb) = params
    mean = x.mean(axis=(2, 3), keepdims=True)
    var = ((x - mean) ** 2).mean(axis=(2, 3), keepdims=True)
    normalized = (x - mean) / jnp.sqrt(var + EPS)

    h = jnp.maximum(segmap.reshape(-1, 11) @ w0 + b0, 0.0)
    for i in range(3):
        h = jnp.maximum(h @ wt[i] + bt[i], 0.0)
    g = h
    for i in range(4):
        g = g @ wg[i] + bg[i]
        if i < 3:
            g = jnp.maximum(g, 0.0)
    b = h
    for i in range(4):
        b = b @ wb[i] + bb[i]
        if i < 3:
            b = jnp.maximum(b, 0.0)
    gamma = g[:, None, :, None]
    beta = b[:, None, :, None]
    return normalized * (1.0 + gamma) + beta


if __name__ == "__main__":
    N, C, H, W = 2, 4, 16, 16    # hidden dim of the MLPs == H, per the module

    key = jax.random.PRNGKey(0)
    kx, ks, kp = jax.random.split(key, 3)
    x = jax.random.normal(kx, (N, C, H, W), jnp.float32)
    segmap = jax.random.normal(ks, (N, 1, 1, 11), jnp.float32)
    params = init_params(kp, H)

    packed = pack_params(params, H, W)       # one-time packing (init-time)

    out = jax.block_until_ready(ran_forward(x, segmap, packed))
    ref = ran_reference(x, segmap, params)

    np.testing.assert_allclose(np.asarray(out), np.asarray(ref),
                               rtol=1e-5, atol=1e-5)
    print("KERNEL_OK")
</pallas_src>

<mosaic_0001>
module attributes {stable_mosaic.version = 11 : i64} {
  func.func @ran_kernel(%arg0: i32, %arg1: memref<2x11xf32, #tpu.memory_space<vmem>>, %arg2: memref<8x2xf32, #tpu.memory_space<vmem>>, %arg3: memref<8x256xf32, #tpu.memory_space<vmem>>, %arg4: memref<11x16xf32, #tpu.memory_space<vmem>>, %arg5: memref<1x16xf32, #tpu.memory_space<vmem>>, %arg6: memref<3x16x16xf32, #tpu.memory_space<vmem>>, %arg7: memref<3x1x16xf32, #tpu.memory_space<vmem>>, %arg8: memref<16x32xf32, #tpu.memory_space<vmem>>, %arg9: memref<1x32xf32, #tpu.memory_space<vmem>>, %arg10: memref<2x32x32xf32, #tpu.memory_space<vmem>>, %arg11: memref<2x1x32xf32, #tpu.memory_space<vmem>>, %arg12: memref<32x512xf32, #tpu.memory_space<vmem>>, %arg13: memref<1x512xf32, #tpu.memory_space<vmem>>, %arg14: memref<8x256xf32, #tpu.memory_space<vmem>>) attributes {dimension_semantics = [#tpu.dimension_semantics<arbitrary>], iteration_bounds = array<i64: 1>, scalar_prefetch = 0 : i64, scratch_operands = 0 : i64, tpu.core_type = #tpu.core_type<tc>, window_params = [{pipeline_mode = #tpu.pipeline_mode<synchronous>, transform_indices = @transform_0, window_bounds = array<i64: 2, 11>}, {transform_indices = @transform_1, window_bounds = array<i64: 8, 2>}, {transform_indices = @transform_2, window_bounds = array<i64: 8, 256>}, {pipeline_mode = #tpu.pipeline_mode<synchronous>, transform_indices = @transform_3, window_bounds = array<i64: 11, 16>}, {pipeline_mode = #tpu.pipeline_mode<synchronous>, transform_indices = @transform_4, window_bounds = array<i64: 1, 16>}, {pipeline_mode = #tpu.pipeline_mode<synchronous>, transform_indices = @transform_5, window_bounds = array<i64: 3, 16, 16>}, {pipeline_mode = #tpu.pipeline_mode<synchronous>, transform_indices = @transform_6, window_bounds = array<i64: 3, 1, 16>}, {pipeline_mode = #tpu.pipeline_mode<synchronous>, transform_indices = @transform_7, window_bounds = array<i64: 16, 32>}, {pipeline_mode = #tpu.pipeline_mode<synchronous>, transform_indices = @transform_8, window_bounds = array<i64: 1, 32>}, {pipeline_mode = #tpu.pipeline_mode<synchronous>, transform_indices = @transform_9, window_bounds = array<i64: 2, 32, 32>}, {pipeline_mode = #tpu.pipeline_mode<synchronous>, transform_indices = @transform_10, window_bounds = array<i64: 2, 1, 32>}, {pipeline_mode = #tpu.pipeline_mode<synchronous>, transform_indices = @transform_11, window_bounds = array<i64: 32, 512>}, {pipeline_mode = #tpu.pipeline_mode<synchronous>, transform_indices = @transform_12, window_bounds = array<i64: 1, 512>}, {transform_indices = @transform_13, window_bounds = array<i64: 8, 256>}]} {
    %c0 = arith.constant 0 : index
    %c0_0 = arith.constant 0 : index
    %0 = vector.load %arg1[%c0, %c0_0] : memref<2x11xf32, #tpu.memory_space<vmem>>, vector<2x11xf32>
    %c0_1 = arith.constant 0 : index
    %c0_2 = arith.constant 0 : index
    %1 = vector.load %arg4[%c0_1, %c0_2] : memref<11x16xf32, #tpu.memory_space<vmem>>, vector<11x16xf32>
    %cst = arith.constant dense<0.000000e+00> : vector<2x16xf32>
    %2 = tpu.matmul %0, %1, %cst {dimension_numbers = #tpu.dot_dimension_numbers<[1], [0], [0], [1], [0, 0, 1, 1], [], []>} : vector<2x11xf32>, vector<11x16xf32>, vector<2x16xf32> -> vector<2x16xf32>
    %c0_3 = arith.constant 0 : index
    %c0_4 = arith.constant 0 : index
    %3 = vector.load %arg5[%c0_3, %c0_4] : memref<1x16xf32, #tpu.memory_space<vmem>>, vector<1x16xf32>
    %4 = vector.broadcast %3 : vector<1x16xf32> to vector<2x16xf32>
    %5 = arith.addf %2, %4 : vector<2x16xf32>
    %cst_5 = arith.constant 0.000000e+00 : f32
    %6 = vector.broadcast %cst_5 : f32 to vector<2x16xf32>
    %7 = arith.maximumf %5, %6 : vector<2x16xf32>
    %c0_6 = arith.constant 0 : index
    %c0_7 = arith.constant 0 : index
    %c0_8 = arith.constant 0 : index
    %8 = vector.load %arg6[%c0_6, %c0_7, %c0_8] : memref<3x16x16xf32, #tpu.memory_space<vmem>>, vector<1x16x16xf32>
    %9 = vector.shape_cast %8 : vector<1x16x16xf32> to vector<16x16xf32>
    %cst_9 = arith.constant dense<0.000000e+00> : vector<2x16xf32>
    %10 = tpu.matmul %7, %9, %cst_9 {dimension_numbers = #tpu.dot_dimension_numbers<[1], [0], [0], [1], [0, 0, 1, 1], [], []>} : vector<2x16xf32>, vector<16x16xf32>, vector<2x16xf32> -> vector<2x16xf32>
    %c0_10 = arith.constant 0 : index
    %c0_11 = arith.constant 0 : index
    %c0_12 = arith.constant 0 : index
    %11 = vector.load %arg7[%c0_10, %c0_11, %c0_12] : memref<3x1x16xf32, #tpu.memory_space<vmem>>, vector<1x1x16xf32>
    %12 = vector.shape_cast %11 : vector<1x1x16xf32> to vector<1x16xf32>
    %13 = vector.broadcast %12 : vector<1x16xf32> to vector<2x16xf32>
    %14 = arith.addf %10, %13 : vector<2x16xf32>
    %cst_13 = arith.constant 0.000000e+00 : f32
    %15 = vector.broadcast %cst_13 : f32 to vector<2x16xf32>
    %16 = arith.maximumf %14, %15 : vector<2x16xf32>
    %c1 = arith.constant 1 : index
    %c0_14 = arith.constant 0 : index
    %c0_15 = arith.constant 0 : index
    %17 = vector.load %arg6[%c1, %c0_14, %c0_15] : memref<3x16x16xf32, #tpu.memory_space<vmem>>, vector<1x16x16xf32>
    %18 = vector.shape_cast %17 : vector<1x16x16xf32> to vector<16x16xf32>
    %cst_16 = arith.constant dense<0.000000e+00> : vector<2x16xf32>
    %19 = tpu.matmul %16, %18, %cst_16 {dimension_numbers = #tpu.dot_dimension_numbers<[1], [0], [0], [1], [0, 0, 1, 1], [], []>} : vector<2x16xf32>, vector<16x16xf32>, vector<2x16xf32> -> vector<2x16xf32>
    %c1_17 = arith.constant 1 : index
    %c0_18 = arith.constant 0 : index
    %c0_19 = arith.constant 0 : index
    %20 = vector.load %arg7[%c1_17, %c0_18, %c0_19] : memref<3x1x16xf32, #tpu.memory_space<vmem>>, vector<1x1x16xf32>
    %21 = vector.shape_cast %20 : vector<1x1x16xf32> to vector<1x16xf32>
    %22 = vector.broadcast %21 : vector<1x16xf32> to vector<2x16xf32>
    %23 = arith.addf %19, %22 : vector<2x16xf32>
    %cst_20 = arith.constant 0.000000e+00 : f32
    %24 = vector.broadcast %cst_20 : f32 to vector<2x16xf32>
    %25 = arith.maximumf %23, %24 : vector<2x16xf32>
    %c2 = arith.constant 2 : index
    %c0_21 = arith.constant 0 : index
    %c0_22 = arith.constant 0 : index
    %26 = vector.load %arg6[%c2, %c0_21, %c0_22] : memref<3x16x16xf32, #tpu.memory_space<vmem>>, vector<1x16x16xf32>
    %27 = vector.shape_cast %26 : vector<1x16x16xf32> to vector<16x16xf32>
    %cst_23 = arith.constant dense<0.000000e+00> : vector<2x16xf32>
    %28 = tpu.matmul %25, %27, %cst_23 {dimension_numbers = #tpu.dot_dimension_numbers<[1], [0], [0], [1], [0, 0, 1, 1], [], []>} : vector<2x16xf32>, vector<16x16xf32>, vector<2x16xf32> -> vector<2x16xf32>
    %c2_24 = arith.constant 2 : index
    %c0_25 = arith.constant 0 : index
    %c0_26 = arith.constant 0 : index
    %29 = vector.load %arg7[%c2_24, %c0_25, %c0_26] : memref<3x1x16xf32, #tpu.memory_space<vmem>>, vector<1x1x16xf32>
    %30 = vector.shape_cast %29 : vector<1x1x16xf32> to vector<1x16xf32>
    %31 = vector.broadcast %30 : vector<1x16xf32> to vector<2x16xf32>
    %32 = arith.addf %28, %31 : vector<2x16xf32>
    %cst_27 = arith.constant 0.000000e+00 : f32
    %33 = vector.broadcast %cst_27 : f32 to vector<2x16xf32>
    %34 = arith.maximumf %32, %33 : vector<2x16xf32>
    %c0_28 = arith.constant 0 : index
    %c0_29 = arith.constant 0 : index
    %35 = vector.load %arg8[%c0_28, %c0_29] : memref<16x32xf32, #tpu.memory_space<vmem>>, vector<16x32xf32>
    %cst_30 = arith.constant dense<0.000000e+00> : vector<2x32xf32>
    %36 = tpu.matmul %34, %35, %cst_30 {dimension_numbers = #tpu.dot_dimension_numbers<[1], [0], [0], [1], [0, 0, 1, 1], [], []>} : vector<2x16xf32>, vector<16x32xf32>, vector<2x32xf32> -> vector<2x32xf32>
    %c0_31 = arith.constant 0 : index
    %c0_32 = arith.constant 0 : index
    %37 = vector.load %arg9[%c0_31, %c0_32] : memref<1x32xf32, #tpu.memory_space<vmem>>, vector<1x32xf32>
    %38 = vector.broadcast %37 : vector<1x32xf32> to vector<2x32xf32>
    %39 = arith.addf %36, %38 : vector<2x32xf32>
    %cst_33 = arith.constant 0.000000e+00 : f32
    %40 = vector.broadcast %cst_33 : f32 to vector<2x32xf32>
    %41 = arith.maximumf %39, %40 : vector<2x32xf32>
    %c0_34 = arith.constant 0 : index
    %c0_35 = arith.constant 0 : index
    %c0_36 = arith.constant 0 : index
    %42 = vector.load %arg10[%c0_34, %c0_35, %c0_36] : memref<2x32x32xf32, #tpu.memory_space<vmem>>, vector<1x32x32xf32>
    %43 = vector.shape_cast %42 : vector<1x32x32xf32> to vector<32x32xf32>
    %cst_37 = arith.constant dense<0.000000e+00> : vector<2x32xf32>
    %44 = tpu.matmul %41, %43, %cst_37 {dimension_numbers = #tpu.dot_dimension_numbers<[1], [0], [0], [1], [0, 0, 1, 1], [], []>} : vector<2x32xf32>, vector<32x32xf32>, vector<2x32xf32> -> vector<2x32xf32>
    %c0_38 = arith.constant 0 : index
    %c0_39 = arith.constant 0 : index
    %c0_40 = arith.constant 0 : index
    %45 = vector.load %arg11[%c0_38, %c0_39, %c0_40] : memref<2x1x32xf32, #tpu.memory_space<vmem>>, vector<1x1x32xf32>
    %46 = vector.shape_cast %45 : vector<1x1x32xf32> to vector<1x32xf32>
    %47 = vector.broadcast %46 : vector<1x32xf32> to vector<2x32xf32>
    %48 = arith.addf %44, %47 : vector<2x32xf32>
    %cst_41 = arith.constant 0.000000e+00 : f32
    %49 = vector.broadcast %cst_41 : f32 to vector<2x32xf32>
    %50 = arith.maximumf %48, %49 : vector<2x32xf32>
    %c1_42 = arith.constant 1 : index
    %c0_43 = arith.constant 0 : index
    %c0_44 = arith.constant 0 : index
    %51 = vector.load %arg10[%c1_42, %c0_43, %c0_44] : memref<2x32x32xf32, #tpu.memory_space<vmem>>, vector<1x32x32xf32>
    %52 = vector.shape_cast %51 : vector<1x32x32xf32> to vector<32x32xf32>
    %cst_45 = arith.constant dense<0.000000e+00> : vector<2x32xf32>
    %53 = tpu.matmul %50, %52, %cst_45 {dimension_numbers = #tpu.dot_dimension_numbers<[1], [0], [0], [1], [0, 0, 1, 1], [], []>} : vector<2x32xf32>, vector<32x32xf32>, vector<2x32xf32> -> vector<2x32xf32>
    %c1_46 = arith.constant 1 : index
    %c0_47 = arith.constant 0 : index
    %c0_48 = arith.constant 0 : index
    %54 = vector.load %arg11[%c1_46, %c0_47, %c0_48] : memref<2x1x32xf32, #tpu.memory_space<vmem>>, vector<1x1x32xf32>
    %55 = vector.shape_cast %54 : vector<1x1x32xf32> to vector<1x32xf32>
    %56 = vector.broadcast %55 : vector<1x32xf32> to vector<2x32xf32>
    %57 = arith.addf %53, %56 : vector<2x32xf32>
    %cst_49 = arith.constant 0.000000e+00 : f32
    %58 = vector.broadcast %cst_49 : f32 to vector<2x32xf32>
    %59 = arith.maximumf %57, %58 : vector<2x32xf32>
    %c0_50 = arith.constant 0 : index
    %c0_51 = arith.constant 0 : index
    %60 = vector.load %arg12[%c0_50, %c0_51] : memref<32x512xf32, #tpu.memory_space<vmem>>, vector<32x512xf32>
    %cst_52 = arith.constant dense<0.000000e+00> : vector<2x512xf32>
    %61 = tpu.matmul %59, %60, %cst_52 {dimension_numbers = #tpu.dot_dimension_numbers<[1], [0], [0], [1], [0, 0, 1, 1], [], []>} : vector<2x32xf32>, vector<32x512xf32>, vector<2x512xf32> -> vector<2x512xf32>
    %c0_53 = arith.constant 0 : index
    %c0_54 = arith.constant 0 : index
    %62 = vector.load %arg13[%c0_53, %c0_54] : memref<1x512xf32, #tpu.memory_space<vmem>>, vector<1x512xf32>
    %63 = vector.broadcast %62 : vector<1x512xf32> to vector<2x512xf32>
    %64 = arith.addf %61, %63 : vector<2x512xf32>
    %c0_55 = arith.constant 0 : index
    %c0_56 = arith.constant 0 : index
    %65 = vector.load %arg2[%c0_55, %c0_56] : memref<8x2xf32, #tpu.memory_space<vmem>>, vector<8x2xf32>
    %cst_57 = arith.constant dense<0.000000e+00> : vector<8x512xf32>
    %66 = tpu.matmul %65, %64, %cst_57 {dimension_numbers = #tpu.dot_dimension_numbers<[1], [0], [0], [1], [0, 0, 1, 1], [], []>} : vector<8x2xf32>, vector<2x512xf32>, vector<8x512xf32> -> vector<8x512xf32>
    %67 = vector.extract_strided_slice %66 {offsets = [0, 0], sizes = [8, 256], strides = [1, 1]} : vector<8x512xf32> to vector<8x256xf32>
    %68 = vector.extract_strided_slice %66 {offsets = [0, 256], sizes = [8, 256], strides = [1, 1]} : vector<8x512xf32> to vector<8x256xf32>
    %c0_58 = arith.constant 0 : index
    %c0_59 = arith.constant 0 : index
    %69 = vector.load %arg3[%c0_58, %c0_59] : memref<8x256xf32, #tpu.memory_space<vmem>>, vector<8x256xf32>
    %cst_60 = arith.constant dense<0.000000e+00> : vector<8xf32>
    %70 = vector.multi_reduction <add>, %69, %cst_60 [1] : vector<8x256xf32> to vector<8xf32>
    %71 = vector.shape_cast %70 : vector<8xf32> to vector<8x1xf32>
    %cst_61 = arith.constant 3.906250e-03 : f32
    %72 = vector.broadcast %cst_61 : f32 to vector<8x1xf32>
    %73 = arith.mulf %71, %72 : vector<8x1xf32>
    %74 = vector.broadcast %73 : vector<8x1xf32> to vector<8x256xf32>
    %75 = arith.subf %69, %74 : vector<8x256xf32>
    %76 = arith.mulf %75, %75 : vector<8x256xf32>
    %cst_62 = arith.constant dense<0.000000e+00> : vector<8xf32>
    %77 = vector.multi_reduction <add>, %76, %cst_62 [1] : vector<8x256xf32> to vector<8xf32>
    %78 = vector.shape_cast %77 : vector<8xf32> to vector<8x1xf32>
    %cst_63 = arith.constant 3.906250e-03 : f32
    %79 = vector.broadcast %cst_63 : f32 to vector<8x1xf32>
    %80 = arith.mulf %78, %79 : vector<8x1xf32>
    %cst_64 = arith.constant 9.99999974E-6 : f32
    %81 = vector.broadcast %cst_64 : f32 to vector<8x1xf32>
    %82 = arith.addf %80, %81 : vector<8x1xf32>
    %83 = math.rsqrt %82 : vector<8x1xf32>
    %84 = vector.broadcast %83 : vector<8x1xf32> to vector<8x256xf32>
    %85 = arith.mulf %84, %67 : vector<8x256xf32>
    %86 = arith.mulf %69, %85 : vector<8x256xf32>
    %87 = vector.broadcast %73 : vector<8x1xf32> to vector<8x256xf32>
    %88 = arith.mulf %87, %85 : vector<8x256xf32>
    %89 = arith.subf %68, %88 : vector<8x256xf32>
    %90 = arith.addf %86, %89 : vector<8x256xf32>
    %c0_65 = arith.constant 0 : index
    %c0_66 = arith.constant 0 : index
    %91 = vector.load %arg14[%c0_65, %c0_66] : memref<8x256xf32, #tpu.memory_space<vmem>>, vector<8x256xf32>
    tpu.vector_store %arg14[%c0_65, %c0_66], %90 {strides = array<i32>} : memref<8x256xf32, #tpu.memory_space<vmem>>, vector<8x256xf32>,
    return
  }
  func.func @transform_0(%arg0: i32) -> (i32, i32) {
    %c0_i32 = arith.constant 0 : i32
    %c0_i32_0 = arith.constant 0 : i32
    %c0_i32_1 = arith.constant 0 : i32
    return %c0_i32, %c0_i32_0 : i32, i32
  }
  func.func @transform_1(%arg0: i32) -> (i32, i32) {
    %c0_i32 = arith.constant 0 : i32
    %c0_i32_0 = arith.constant 0 : i32
    return %arg0, %c0_i32 : i32, i32
  }
  func.func @transform_2(%arg0: i32) -> (i32, i32) {
    %c0_i32 = arith.constant 0 : i32
    %c0_i32_0 = arith.constant 0 : i32
    return %arg0, %c0_i32 : i32, i32
  }
  func.func @transform_3(%arg0: i32) -> (i32, i32) {
    %c0_i32 = arith.constant 0 : i32
    %c0_i32_0 = arith.constant 0 : i32
    %c0_i32_1 = arith.constant 0 : i32
    return %c0_i32, %c0_i32_0 : i32, i32
  }
  func.func @transform_4(%arg0: i32) -> (i32, i32) {
    %c0_i32 = arith.constant 0 : i32
    %c0_i32_0 = arith.constant 0 : i32
    %c0_i32_1 = arith.constant 0 : i32
    return %c0_i32, %c0_i32_0 : i32, i32
  }
  func.func @transform_5(%arg0: i32) -> (i32, i32, i32) {
    %c0_i32 = arith.constant 0 : i32
    %c0_i32_0 = arith.constant 0 : i32
    %c0_i32_1 = arith.constant 0 : i32
    %c0_i32_2 = arith.constant 0 : i32
    return %c0_i32, %c0_i32_0, %c0_i32_1 : i32, i32, i32
  }
  func.func @transform_6(%arg0: i32) -> (i32, i32, i32) {
    %c0_i32 = arith.constant 0 : i32
    %c0_i32_0 = arith.constant 0 : i32
    %c0_i32_1 = arith.constant 0 : i32
    %c0_i32_2 = arith.constant 0 : i32
    return %c0_i32, %c0_i32_0, %c0_i32_1 : i32, i32, i32
  }
  func.func @transform_7(%arg0: i32) -> (i32, i32) {
    %c0_i32 = arith.constant 0 : i32
    %c0_i32_0 = arith.constant 0 : i32
    %c0_i32_1 = arith.constant 0 : i32
    return %c0_i32, %c0_i32_0 : i32, i32
  }
  func.func @transform_8(%arg0: i32) -> (i32, i32) {
    %c0_i32 = arith.constant 0 : i32
    %c0_i32_0 = arith.constant 0 : i32
    %c0_i32_1 = arith.constant 0 : i32
    return %c0_i32, %c0_i32_0 : i32, i32
  }
  func.func @transform_9(%arg0: i32) -> (i32, i32, i32) {
    %c0_i32 = arith.constant 0 : i32
    %c0_i32_0 = arith.constant 0 : i32
    %c0_i32_1 = arith.constant 0 : i32
    %c0_i32_2 = arith.constant 0 : i32
    return %c0_i32, %c0_i32_0, %c0_i32_1 : i32, i32, i32
  }
  func.func @transform_10(%arg0: i32) -> (i32, i32, i32) {
    %c0_i32 = arith.constant 0 : i32
    %c0_i32_0 = arith.constant 0 : i32
    %c0_i32_1 = arith.constant 0 : i32
    %c0_i32_2 = arith.constant 0 : i32
    return %c0_i32, %c0_i32_0, %c0_i32_1 : i32, i32, i32
  }
  func.func @transform_11(%arg0: i32) -> (i32, i32) {
    %c0_i32 = arith.constant 0 : i32
    %c0_i32_0 = arith.constant 0 : i32
    %c0_i32_1 = arith.constant 0 : i32
    return %c0_i32, %c0_i32_0 : i32, i32
  }
  func.func @transform_12(%arg0: i32) -> (i32, i32) {
    %c0_i32 = arith.constant 0 : i32
    %c0_i32_0 = arith.constant 0 : i32
    %c0_i32_1 = arith.constant 0 : i32
    return %c0_i32, %c0_i32_0 : i32, i32
  }
  func.func @transform_13(%arg0: i32) -> (i32, i32) {
    %c0_i32 = arith.constant 0 : i32
    %c0_i32_0 = arith.constant 0 : i32
    return %arg0, %c0_i32 : i32, i32
  }
}

</mosaic_0001>

<bundles_post_ra>
// kernel: ran_forward.1
= control target key start
LH: loop header
LB: loop body
LE: loop exit
PB: predicated region body
PF: predicated region fallthrough
CT: control target
= control target key end

     0   :  { %18 = vsyncpa [#allocation3], 0  ;;  %s1441_s0 = inlined_call_operand.vmem [shape: f32[2,11], index: 0, kind: input, shape index: {}]   ;;  %s1442_s1 = inlined_call_operand.vmem [shape: f32[8,2], index: 1, kind: input, shape index: {}]   ;;  %s1443_s2 = inlined_call_operand.vmem [shape: f32[8,256], index: 2, kind: input, shape index: {}]   ;;  %s1444_s3 = inlined_call_operand.vmem [shape: f32[11,16], index: 3, kind: input, shape index: {}]   ;;  %s1445_s4 = inlined_call_operand.vmem [shape: f32[1,16], index: 4, kind: input, shape index: {}]   ;;  %s1446_s5 = inlined_call_operand.hbm [shape: f32[3,16,16], index: 5, kind: input, shape index: {}]   ;;  %s1447_s6 = inlined_call_operand.vmem [shape: f32[3,1,16], index: 6, kind: input, shape index: {}]   ;;  %s1448_s7 = inlined_call_operand.vmem [shape: f32[16,32], index: 7, kind: input, shape index: {}]   ;;  %s1449_s8 = inlined_call_operand.vmem [shape: f32[1,32], index: 8, kind: input, shape index: {}]   ;;  %s1450_s9 = inlined_call_operand.hbm [shape: f32[2,32,32], index: 9, kind: input, shape index: {}]   ;;  %s1451_s10 = inlined_call_operand.vmem [shape: f32[2,1,32], index: 10, kind: input, shape index: {}]   ;;  %s1452_s11 = inlined_call_operand.vmem [shape: f32[32,512], index: 11, kind: input, shape index: {}]   ;;  %s1453_s12 = inlined_call_operand.vmem [shape: f32[1,512], index: 12, kind: input, shape index: {}]   ;;  %s1454_s13 = inlined_call_operand.vmem [shape: f32[8,256], index: 13, kind: output, shape index: {}]  }
   0x1   :  { %19 = vsyncpa [#allocation5], 0  ;;  %s1208_s25 = smov [#allocation2]  }
   0x2   :  { %s35_s26 = sshll.u32 %s1208_s25, 4  ;;  %s36_s26 = int_to_ptr.vmem [resolvable:$true] %s35_s26 }
   0x3   :  { %s1172_s27 = scalar_lea.vmem %s36_s26, 768  ;;  %p1177_p1 = scmp.lt.s32.totalorder %s36_s26, %s36_s26 }
   0x4   :  { %p1173_p0 = scmp.ne.s32.totalorder %s36_s26, %s1172_s27  ;;  %p1178_p2 = scmp.lt.s32.totalorder %s1172_s27, %s1172_s27 }
   0x6   :  { %p1179_p3 = por %p1178_p2, %p1177_p1 }
   0x8   :  { %p1180_p4 = pnand %p1179_p3, %p1173_p0 }
   0xa   :  { %1183 = shalt.err (!%p1180_p4)
}
   0xb   :  { %s1209_s28 = smov 128   ;;  %s1210_s29 = smov 8  }
   0xc   :  { %41 = dma.hbm_to_vmem [thread:$0]  %s1446_s5, 768, %s36_s26, [#allocation3], %s1209_s28, %s1209_s28, %s1210_s29  }
   0xd   :  { %s1211_s15 = smov [#allocation4]  }
   0xe   :  { %s53_s16 = sshll.u32 %s1211_s15, 4  ;;  %s54_s16 = int_to_ptr.vmem [resolvable:$true] %s53_s16 }
   0xf   :  { %s1192_s17 = scalar_lea.vmem %s54_s16, 1024  ;;  %p1197_p6 = scmp.lt.s32.totalorder %s54_s16, %s54_s16 }
  0x10   :  { %p1193_p5 = scmp.ne.s32.totalorder %s54_s16, %s1192_s17  ;;  %p1198_p7 = scmp.lt.s32.totalorder %s1192_s17, %s1192_s17 }
  0x12   :  { %p1199_p8 = por %p1198_p7, %p1197_p6 }
  0x14   :  { %p1200_p9 = pnand %p1199_p8, %p1193_p5 }
  0x16   :  { %1203 = shalt.err (!%p1200_p9)
}
  0x17   :  { %59 = dma.hbm_to_vmem [thread:$0]  %s1450_s9, 1024, %s54_s16, [#allocation5], %s1209_s28, %s1209_s28, %s1210_s29  }
  0x18   :  { %1204 = dma.done.wait [#allocation3], 768  }
  0x19   :  { %1205 = vsyncadd [#allocation3], 4294966528 }
  0x1a   :  { %1206 = dma.done.wait [#allocation5], 1024  }
  0x1b   :  { %1207 = vsyncadd [#allocation5], 4294966272  ;;  %v1212_v0 = vmov 0.0   ;;  %vm1213_vm0 = vmmov 0   ;;  %vm86_vm1 = vcmask 1042432   ;;  %v73_v2 = vld [vmem:[%s1444_s3] sm:$0xff] }
  0x1c   :  { %1099 = vmatprep.subr.mxu0 %v1212_v0  ;;  %1103 = vmatprep.mubr.msk.f32.mxu0 %vm1213_vm0, %v1212_v0  ;;  %v74_v1 = vld [vmem:[%s1444_s3 + $0x8] sm:$0x7]  ;;  %v72_v3 = vld [vmem:[%s1441_s0] sm:$0x3]  ;;  %vm82_vm2 = vcmask 89088   ;;  %vm170_vm3 = vcmask 130048  }
  0x1d   :  { %1106 = vmatprep.subr.mxu1 %v1212_v0  ;;  %1110 = vmatprep.mubr.msk.f32.mxu1 %vm1213_vm0, %v1212_v0  ;;  %v162_v4 = vld [vmem:[#allocation2 + $0x8] sm:$0xff]  ;;  %v161_v5 = vld [vmem:[#allocation2] sm:$0xff]  ;;  %v247_v11 = vld [vmem:[#allocation2 + $0x18] sm:$0xff]  ;;  %vm509_vm4 = vcmask 261120   ;;  %vm859_vm5 = vcmask 1041408   ;;  %vm855_vm6 = vcmask 15360  }
  0x1e   :  { %1100 = vmatpush3.msk.msra.mxu0 %vm86_vm1, %v74_v1  ;;  %1107 = vmatpush3.msra.mxu1 %v162_v4  ;;  %v1048_v6 = vld [vmem:[%s1445_s4] ss:$0 sm:$0xff]  ;;  %v246_v12 = vld [vmem:[#allocation2 + $0x10] sm:$0xff]  ;;  %v332_v18 = vld [vmem:[#allocation2 + $0x28] sm:$0xff] }
  0x1f   :  { %1101 = vmatprep.subr.mxu0 %v1212_v0  ;;  %1108 = vmatprep.subr.mxu1 %v1212_v0  ;;  %v1051_v13 = vld [vmem:[%s1447_s6] ss:$0 sm:$0xff]  ;;  %v1054_v20 = vld [vmem:[%s1447_s6 + $0x1] ss:$0 sm:$0xff]  ;;  %v416_v25 = vld [vmem:[%s1448_s7 + $0x8] sm:$0xff] }
  0x20   :  { %1102 = vmatpush3.msra.mxu0 %v73_v2  ;;  %1109 = vmatpush3.msra.mxu1 %v161_v5  ;;  %v331_v19 = vld [vmem:[#allocation2 + $0x20] sm:$0xff]  ;;  %v501_v27 = vld [vmem:[#allocation4 + $0x18] sm:$0xff]  ;;  %v499_v34 = vld [vmem:[#allocation4 + $0x8] sm:$0xff] }
  0x21   :  { %1104 = vmatmul.mubr.msk.f32.vlgmr.msra.gmra.mxu0 %vm82_vm2, %v72_v3  ;;  %1113 = vmatprep.subr.mxu0 %v1212_v0  ;;  %v415_v26 = vld [vmem:[%s1448_s7] sm:$0xff]  ;;  %v498_v35 = vld [vmem:[#allocation4] sm:$0xff]  ;;  %v588_v36 = vld [vmem:[#allocation4 + $0x38] sm:$0xff] }
  0x22   :  { %1117 = vmatprep.mubr.msk.f32.mxu0 %vm1213_vm0, %v1212_v0  ;;  %1120 = vmatprep.subr.mxu1 %v1212_v0  ;;  %v1057_v28 = vld [vmem:[%s1447_s6 + $0x2] ss:$0 sm:$0xff]  ;;  %v1059_v37 = vld [vmem:[%s1449_s8] ss:$0 sm:$0xff]  ;;  %v586_v43 = vld [vmem:[#allocation4 + $0x28] sm:$0xff] }
  0x23   :  { %1114 = vmatpush3.msra.mxu0 %v247_v11  ;;  %v500_v33 = vld [vmem:[#allocation4 + $0x10] sm:$0xff]  ;;  %v585_v44 = vld [vmem:[#allocation4 + $0x20] sm:$0xff]  ;;  %v684_v45 = vld [vmem:[%s1452_s11 + $0x68] sm:$0xff] }
  0x24   :  { %1115 = vmatprep.subr.mxu0 %v1212_v0  ;;  %v587_v42 = vld [vmem:[#allocation4 + $0x30] sm:$0xff]  ;;  %v686_v46 = vld [vmem:[%s1452_s11 + $0x78] sm:$0xff]  ;;  %v680_v48 = vld [vmem:[%s1452_s11 + $0x48] sm:$0xff] }
  0x25   :  { %1116 = vmatpush3.msra.mxu0 %v246_v12  ;;  %v683_v47 = vld [vmem:[%s1452_s11 + $0x60] sm:$0xff]  ;;  %v685_v54 = vld [vmem:[%s1452_s11 + $0x70] sm:$0xff]  ;;  %v682_v55 = vld [vmem:[%s1452_s11 + $0x58] sm:$0xff] }
  0x26   :  { %1127 = vmatprep.subr.mxu0 %v1212_v0  ;;  %v1061_v49 = vld [vmem:[%s1451_s10] ss:$0 sm:$0xff]  ;;  %v681_v57 = vld [vmem:[%s1452_s11 + $0x50] sm:$0xff]  ;;  %v676_v58 = vld [vmem:[%s1452_s11 + $0x28] sm:$0xff] }
  0x27   :  { %v679_v56 = vld [vmem:[%s1452_s11 + $0x40] sm:$0xff]  ;;  %v678_v59 = vld [vmem:[%s1452_s11 + $0x38] sm:$0xff]  ;;  %v677_v61 = vld [vmem:[%s1452_s11 + $0x30] sm:$0xff] }
  0x28   :  { %v675_v60 = vld [vmem:[%s1452_s11 + $0x20] sm:$0xff]  ;;  %v672_v62 = vld [vmem:[%s1452_s11 + $0x8] sm:$0xff]  ;;  %v674_v63 = vld [vmem:[%s1452_s11 + $0x18] sm:$0xff] }
  0x29   :  { %v671_v1 = vld [vmem:[%s1452_s11] sm:$0xff]  ;;  %v673_v2 = vld [vmem:[%s1452_s11 + $0x10] sm:$0xff]  ;;  %v1417_v4 = vld [vmem:[%s1443_s2 + $0x8] sm:$0xff] }
  0x2a   :  { %v1014_v3 = vld [vmem:[%s1443_s2] sm:$0xff] }
  0x2b   :  { %v1016_v5 = vadd.f32 %v1417_v4, %v1014_v3 }
  0x2d   :  { %1017 = vadd.xlane.f32.xlu0 %v1016_v5 }
  0xb6   :  { %v1018_v11 = vpop.xlane.xlu0 %1017 }
  0xb7   :  { %v1019_v12 = vmul.f32 0.00390625, %v1018_v11 }
  0xe1   :  { %v156_v7 = vpop.f32.mrf.mxu0 }
  0xe2   :  { %v157_v8 = vadd.f32 %v1048_v6, %v156_v7  ;;  %v1064_v6 = vld [vmem:[%s1451_s10 + $0x1] ss:$0 sm:$0xff] }
  0xe3   :  { %v1105_v9 = vpop.f32.mrf.mxu0 }
  0xe4   :  { %v160_v10 = vmax.f32 %v157_v8, 0.0 }
  0xe6   :  { %1111 = vmatmul.mubr.msk.f32.vlgmr.msra.gmra.mxu1 %vm170_vm3, %v160_v10 }
  0xe7   :  { %1124 = vmatprep.mubr.msk.f32.mxu1 %vm1213_vm0, %v1212_v0  ;;  %1121 = vmatpush3.msra.mxu1 %v332_v18  ;;  %v689_v18 = vlaneseq }
  0xe8   :  { %1122 = vmatprep.subr.mxu1 %v1212_v0 }
  0xe9   :  { %1123 = vmatpush3.msra.mxu1 %v331_v19  ;;  %v690_v19 = vshrl.u32 %v689_v18, 7 }
  0xea   :  { %1134 = vmatprep.subr.mxu1 %v1212_v0 }
 0x1a6   :  { %v240_v14 = vpop.f32.mrf.mxu1 }
 0x1a7   :  { %v241_v15 = vadd.f32 %v1051_v13, %v240_v14  ;;  %v1020_v13 = vsub.f32 %v1014_v3, %v1019_v12  ;;  %v1021_v14 = vsub.f32 %v1417_v4, %v1019_v12 }
 0x1a8   :  { %v1112_v16 = vpop.f32.mrf.mxu1 }
 0x1a9   :  { %v244_v17 = vmax.f32 %v241_v15, 0.0  ;;  %v1022_v15 = vmul.f32 %v1020_v13, %v1020_v13  ;;  %v1023_v16 = vmul.f32 %v1021_v14, %v1021_v14 }
 0x1ab   :  { %1118 = vmatmul.mubr.msk.f32.vlgmr.msra.gmra.mxu0 %vm170_vm3, %v244_v17  ;;  %v1024_v17 = vadd.f32 %v1023_v16, %v1022_v15 }
 0x1ac   :  { %1131 = vmatprep.mubr.msk.f32.mxu0 %vm1213_vm0, %v1212_v0  ;;  %1128 = vmatpush3.msra.mxu0 %v416_v25 }
 0x1ad   :  { %1129 = vmatprep.subr.mxu0 %v1212_v0  ;;  %1025 = vadd.xlane.f32.xlu0 %v1024_v17 }
 0x1ae   :  { %1130 = vmatpush3.msra.mxu0 %v415_v26 }
 0x1af   :  { %1145 = vmatprep.subr.mxu0 %v1212_v0 }
 0x26b   :  { %v325_v21 = vpop.f32.mrf.mxu0 }
 0x26c   :  { %v326_v22 = vadd.f32 %v1054_v20, %v325_v21  ;;  %v695_v20 = vsub.s32 1, %v690_v19  ;;  %v703_v21 = vsub.s32 3, %v690_v19 }
 0x26d   :  { %v1119_v23 = vpop.f32.mrf.mxu0 }
 0x26e   :  { %v329_v24 = vmax.f32 %v326_v22, 0.0  ;;  %v691_v22 = vsub.s32 0, %v690_v19  ;;  %v699_v23 = vsub.s32 2, %v690_v19 }
 0x270   :  { %1125 = vmatmul.mubr.msk.f32.vlgmr.msra.gmra.mxu1 %vm170_vm3, %v329_v24  ;;  %v687_v24 = vld [vmem:[%s1453_s12] sm:$0xf] }
 0x271   :  { %1142 = vmatprep.mubr.msk.f32.mxu1 %vm1213_vm0, %v1212_v0  ;;  %1135 = vmatpush3.msra.mxu1 %v501_v27  ;;  %v704_v25 = vrot.slane %v687_v24, %v703_v21  ;;  %v692_v26 = vrot.slane %v687_v24, %v691_v22 }
 0x272   :  { %1136 = vmatprep.subr.mxu1 %v1212_v0 }
 0x273   :  { %1137 = vmatpush3.msra.mxu1 %v500_v33 }
 0x274   :  { %1138 = vmatprep.subr.mxu1 %v1212_v0 }
 0x275   :  { %1139 = vmatpush3.msra.mxu1 %v499_v34 }
 0x276   :  { %1140 = vmatprep.subr.mxu1 %v1212_v0 }
 0x277   :  { %1141 = vmatpush3.msra.mxu1 %v498_v35 }
 0x278   :  { %736 = vmatprep.subr.mxu1 %v684_v45 }
 0x330   :  { %v410_v29 = vpop.f32.mrf.mxu1 }
 0x331   :  { %v411_v30 = vadd.f32 %v1057_v28, %v410_v29  ;;  %v700_v28 = vrot.slane %v687_v24, %v699_v23 }
 0x332   :  { %v1126_v31 = vpop.f32.mrf.mxu1 }
 0x333   :  { %v414_v32 = vmax.f32 %v411_v30, 0.0 }
 0x335   :  { %1132 = vmatmul.mubr.msk.f32.vlgmr.msra.gmra.mxu0 %vm170_vm3, %v414_v32 }
 0x336   :  { %1153 = vmatprep.mubr.msk.f32.mxu0 %vm1213_vm0, %v1212_v0  ;;  %1146 = vmatpush3.msra.mxu0 %v588_v36  ;;  %v854_v36 = vld [vmem:[%s1442_s1] sm:$0xff] }
 0x337   :  { %1147 = vmatprep.subr.mxu0 %v1212_v0 }
 0x338   :  { %1148 = vmatpush3.msra.mxu0 %v587_v42 }
 0x339   :  { %1149 = vmatprep.subr.mxu0 %v1212_v0 }
 0x33a   :  { %1150 = vmatpush3.msra.mxu0 %v586_v43 }
 0x33b   :  { %1151 = vmatprep.subr.mxu0 %v1212_v0 }
 0x33c   :  { %1152 = vmatpush3.msra.mxu0 %v585_v44 }
 0x33d   :  { %807 = vmatprep.subr.mxu0 %v686_v46 }
 0x3f5   :  { %v493_v38 = vpop.f32.mrf.mxu0 }
 0x3f6   :  { %v494_v39 = vadd.f32 %v1059_v37, %v493_v38  ;;  %v1026_v37 = vpop.xlane.xlu0 %1025 }
 0x3f7   :  { %v1133_v40 = vpop.f32.mrf.mxu0  ;;  %v1027_v38 = vmul.f32 0.00390625, %v1026_v37 }
 0x3f8   :  { %v497_v41 = vmax.f32 %v494_v39, 0.0 }
 0x3f9   :  { %v1028_v39 = vadd.f32 1e-05, %v1027_v38 }
 0x3fa   :  { %1143 = vmatmul.mubr.msk.f32.vlgmr.msra.gmra.mxu1 %vm509_vm4, %v497_v41 }
 0x3fb   :  { %776 = vmatprep.mubr.f32.mxu1 %v1212_v0  ;;  %737 = vmatpush1.msra.mxu1 %v683_v47  ;;  %1162 = vrsqrt.f32 %v1028_v39 }
 0x3fc   :  { %738 = vmatprep.subr.mxu1 %v680_v48 }
 0x3fd   :  { %739 = vmatpush1.msra.mxu1 %v679_v56 }
 0x3fe   :  { %740 = vmatprep.subr.mxu1 %v676_v58 }
 0x3ff   :  { %741 = vmatpush1.msra.mxu1 %v675_v60 }
 0x400   :  { %742 = vmatprep.subr.mxu1 %v672_v62 }
 0x401   :  { %743 = vmatpush1.msra.mxu1 %v671_v1 }
 0x408   :  { %v1163_v40 = vpop.eup %1162 }
 0x4ba   :  { %v579_v50 = vpop.f32.mrf.mxu1 }
 0x4bb   :  { %v580_v51 = vadd.f32 %v1061_v49, %v579_v50 }
 0x4bc   :  { %v1144_v52 = vpop.f32.mrf.mxu1 }
 0x4bd   :  { %v583_v53 = vmax.f32 %v580_v51, 0.0 }
 0x4bf   :  { %1154 = vmatmul.mubr.msk.f32.vlgmr.msra.gmra.mxu0 %vm509_vm4, %v583_v53 }
 0x4c0   :  { %808 = vmatpush1.msra.mxu0 %v685_v54  ;;  %847 = vmatprep.mubr.f32.mxu0 %v1212_v0 }
 0x4c1   :  { %809 = vmatprep.subr.mxu0 %v682_v55 }
 0x4c2   :  { %810 = vmatpush1.msra.mxu0 %v681_v57 }
 0x4c3   :  { %811 = vmatprep.subr.mxu0 %v678_v59 }
 0x4c4   :  { %812 = vmatpush1.msra.mxu0 %v677_v61 }
 0x4c5   :  { %813 = vmatprep.subr.mxu0 %v674_v63 }
 0x4c6   :  { %814 = vmatpush1.msra.mxu0 %v673_v2 }
 0x57f   :  { %v666_v7 = vpop.f32.mrf.mxu0 }
 0x580   :  { %v667_v8 = vadd.f32 %v1064_v6, %v666_v7 }
 0x581   :  { %v1155_v9 = vpop.f32.mrf.mxu0 }
 0x582   :  { %v670_v10 = vmax.f32 %v667_v8, 0.0 }
 0x584   :  { %1066 = vmatmul.mubr.msk.f32.vlgmr.msra.gmra.mxu1 %vm509_vm4, %v670_v10  ;;  %1067 = vmatmul.mubr.msk.f32.vlgmr.msra.gmra.mxu0 %vm509_vm4, %v670_v10 }
 0x585   :  { %936 = vmatprep.mubr.f32.mxu1 %v1212_v0  ;;  %1007 = vmatprep.mubr.f32.mxu0 %v1212_v0  ;;  %v696_v0 = vrot.slane %v687_v24, %v695_v20 }
 0x644   :  { %v778_v27 = vpop.f32.mrf.mxu1  ;;  %v849_v29 = vpop.f32.mrf.mxu0 }
 0x645   :  { %v779_v34 = vadd.f32 %v778_v27, %v692_v26  ;;  %v850_v35 = vadd.f32 %v849_v29, %v700_v28 }
 0x646   :  { %v780_v30 = vpop.f32.mrf.mxu1  ;;  %v851_v31 = vpop.f32.mrf.mxu0 }
 0x647   :  { %v781_v32 = vadd.f32 %v780_v30, %v696_v0  ;;  %v852_v33 = vadd.f32 %v851_v31, %v704_v25 }
 0x649   :  { %1068 = vmatprep.subr.msk.mxu1 %vm859_vm5, %v781_v32  ;;  %1071 = vmatprep.subr.msk.mxu0 %vm859_vm5, %v852_v33 }
 0x64a   :  { %1069 = vmatpush1.msk.msra.mxu1 %vm859_vm5, %v779_v34  ;;  %1072 = vmatpush1.msk.msra.mxu0 %vm859_vm5, %v850_v35 }
 0x64b   :  { %1070 = vmatmul.mubr.msk.f32.vlgmr.msra.gmra.mxu1 %vm855_vm6, %v854_v36  ;;  %1073 = vmatmul.mubr.msk.f32.vlgmr.msra.gmra.mxu0 %vm855_vm6, %v854_v36 }
 0x70b   :  { %v938_v41 = vpop.f32.mrf.mxu1  ;;  %v1009_v44 = vpop.f32.mrf.mxu0 }
 0x70c   :  { %v1030_v42 = vmul.f32 %v1163_v40, %v938_v41 }
 0x70d   :  { %v940_v43 = vpop.f32.mrf.mxu1  ;;  %v1011_v50 = vpop.f32.mrf.mxu0 }
 0x70e   :  { %v1031_v45 = vmul.f32 %v1163_v40, %v940_v43  ;;  %v1034_v46 = vmul.f32 %v1030_v42, %v1019_v12  ;;  %v1032_v47 = vmul.f32 %v1030_v42, %v1014_v3 }
 0x710   :  { %v1036_v48 = vsub.f32 %v1009_v44, %v1034_v46  ;;  %v1035_v49 = vmul.f32 %v1031_v45, %v1019_v12  ;;  %v1033_v51 = vmul.f32 %v1031_v45, %v1417_v4 }
 0x712   :  { %v1038_v52 = vadd.f32 %v1036_v48, %v1032_v47  ;;  %v1037_v53 = vsub.f32 %v1011_v50, %v1035_v49 }
 0x714   :  { %1040 = vst [vmem:[%s1454_s13] sm:$0xff] %v1038_v52  ;;  %v1039_v54 = vadd.f32 %v1037_v53, %v1033_v51 }
 0x716   :  { %1041 = vst [vmem:[%s1454_s13 + $0x8] sm:$0xff] %v1039_v54 }
 0x717   :  { %1046 = vsyncpa [#allocation3], 1 }
 0x718   :  { %1047 = vsyncpa [#allocation5], 1 }

</bundles_post_ra>
